<compile_context>
chip_gen: v6e
topology: v6e:2x2x1
jax: 0.10.0
libtpu: 0.0.40
codegen_flags: <defaults>
</compile_context>

<pallas_src>
import functools

import jax
import jax.numpy as jnp
from jax import lax
from jax.experimental import pallas as pl
from jax.experimental.pallas import tpu as pltpu


# --------------------------- tiled projection matmul ---------------------------

def _matmul_kernel(x_ref, w_ref, o_ref, acc_ref):
    @pl.when(pl.program_id(2) == 0)
    def _():
        acc_ref[...] = jnp.zeros_like(acc_ref)

    acc_ref[...] += jnp.dot(x_ref[...], w_ref[...],
                            preferred_element_type=jnp.float32)

    @pl.when(pl.program_id(2) == pl.num_programs(2) - 1)
    def _():
        o_ref[...] = acc_ref[...].astype(o_ref.dtype)


def _round_up(x, m):
    return (x + m - 1) // m * m


def _tiled_matmul(x, w, out_dtype=jnp.bfloat16, tm=256, tn=512, tk=512):
    """x:[M,K] @ w:[K,N] -> [M,N]; bf16 MXU inputs, f32 VMEM accumulator.

    Tiles are (8,128)-aligned; non-divisible dims are zero-padded (exact) and the
    extra rows/cols are sliced off afterwards (lane-dense, unmasked stores).
    """
    M, K = x.shape
    K2, N = w.shape
    assert K == K2
    tm = min(tm, _round_up(M, 8))
    tn = min(tn, _round_up(N, 128))
    tk = min(tk, _round_up(K, 128))
    Mp, Kp, Np = _round_up(M, tm), _round_up(K, tk), _round_up(N, tn)
    if (Mp, Kp) != (M, K):
        x = jnp.pad(x, ((0, Mp - M), (0, Kp - K)))
    if (Kp, Np) != (K, N):
        w = jnp.pad(w, ((0, Kp - K), (0, Np - N)))
    out = pl.pallas_call(
        _matmul_kernel,
        out_shape=jax.ShapeDtypeStruct((Mp, Np), out_dtype),
        grid=(Mp // tm, Np // tn, Kp // tk),
        in_specs=[pl.BlockSpec((tm, tk), lambda i, j, k: (i, k)),
                  pl.BlockSpec((tk, tn), lambda i, j, k: (k, j))],
        out_specs=pl.BlockSpec((tm, tn), lambda i, j, k: (i, j)),
        scratch_shapes=[pltpu.VMEM((tm, tn), jnp.float32)],
        compiler_params=pltpu.CompilerParams(
            dimension_semantics=("parallel", "parallel", "arbitrary")),
    )(x, w)
    if (Mp, Np) != (M, N):
        out = out[:M, :N]
    return out


# ------------------------- fused relative attention kernel -------------------------

def _rel_shift_transposed(bd_ext, q_start):
    """Exact Transformer-XL _rel_shift, applied to transposed (K, tq) score tiles.

    bd_ext[:, l] (l < tq) holds q_{q_start+l} . r_k[m] at key m; column tq holds
    the same for the next q tile's first query (needed only for the boundary
    lane's entries above the diagonal).  Returns s[m, l] == _rel_shift(BD)
    [q_start+l, m], bit-for-bit replicating the PyTorch zero-pad + view trick,
    including the zero band at m == i+1 and the "garbage" entries above it
    (the unmasked softmax really consumes them).

    All movement is a log2(K) sublane barrel (uniform rolls + iota-mask selects)
    plus one static one-lane shift.
    # TODO(synk): a single strided XLU roll, pltpu.roll(bd_ext, shift=1, axis=0,
    # stride=1, stride_axis=1), can replace the barrel once its lowering is
    # verified for these tile shapes.
    """
    K, tq1 = bd_ext.shape
    tq = tq1 - 1
    lane_ext = lax.broadcasted_iota(jnp.int32, (K, tq1), 1)
    gidx_ext = q_start + lane_ext                     # global query index / column
    amt = (K - 1 - gidx_ext) % K                      # sublane roll-up amount
    t = bd_ext
    b = 1
    while b < K:
        rolled = jnp.concatenate([t[b:], t[:b]], axis=0)   # uniform roll up by b
        t = jnp.where((amt & b) != 0, rolled, t)
        b <<= 1
    valid = t[:, :tq]       # rel_shift values on/below the diagonal
    garbage = t[:, 1:]      # rel_shift values above the (i+1) zero band
    sub = lax.broadcasted_iota(jnp.int32, (K, tq), 0)       # key index m
    gidx = q_start + lax.broadcasted_iota(jnp.int32, (K, tq), 1)
    zero = jnp.zeros_like(valid)
    return jnp.where(sub <= gidx, valid, jnp.where(sub == gidx + 1, zero, garbage))


def _fused_attn_kernel(qkv_ref, rk_ref, res_ref, wot_ref, gamma_ref, beta_ref,
                       out_ref, av_ref, *, n_head, d_head):
    nhd = n_head * d_head
    K = qkv_ref.shape[1]            # full key length (resident block)
    tq = out_ref.shape[1]           # q tile handled by this grid step
    q_start = pl.multiple_of(pl.program_id(1) * tq, 8)
    # First row of the next q tile (rel-shift boundary column).  Clamped to stay
    # in bounds; the clamped value is only ever selected for the global last
    # query, whose garbage region is empty.
    next_start = jnp.minimum(q_start + tq, K - 8)

    q_rows = qkv_ref[0, pl.ds(q_start, tq), :]        # (tq, 3*nhd) bf16
    q_extra = qkv_ref[0, pl.ds(next_start, 8), :]     # (8,  3*nhd) bf16

    c_nt = (((1,), (1,)), ((), ()))   # A @ B^T   (contract last dims)
    c_tn = (((0,), (0,)), ((), ()))   # A^T @ B   (contract first dims)

    for h in range(n_head):
        sl = slice(h * d_head, (h + 1) * d_head)
        qh = q_rows[:, sl]                                              # (tq, dh)
        qx = q_extra[0:1, sl]                                           # (1, dh)
        kh = qkv_ref[0, :, nhd + h * d_head: nhd + (h + 1) * d_head]    # (K, dh)
        vh = qkv_ref[0, :, 2 * nhd + h * d_head: 2 * nhd + (h + 1) * d_head]
        rkh = rk_ref[:, sl]                                             # (K, dh)

        # Transposed (K, tq) scores: every rel-shift move stays on the sublane axis.
        ac_t = lax.dot_general(kh, qh, c_nt, preferred_element_type=jnp.float32)
        bd_t = lax.dot_general(rkh, qh, c_nt, preferred_element_type=jnp.float32)
        # Boundary column: scores of the next tile's first query (VPU mat-vec).
        bd_x = jnp.sum(rkh.astype(jnp.float32) * qx.astype(jnp.float32),
                       axis=1, keepdims=True)                           # (K, 1)
        bd_ext = jnp.concatenate([bd_t, bd_x], axis=1)                  # (K, tq+1)

        s_t = ac_t + _rel_shift_transposed(bd_ext, q_start)             # (K, tq)

        m = jnp.max(s_t, axis=0, keepdims=True)       # softmax over keys (axis 0)
        e = jnp.exp(s_t - m)
        l = jnp.sum(e, axis=0, keepdims=True)
        # approx reciprocal: ~1e-3 relative error, deliberate EUP-throughput trade.
        p_t = (e * pl.reciprocal(l, approx=True)).astype(jnp.bfloat16)

        # TODO(synk): dump MLIR for this first-dim contraction; if Mosaic
        # materializes a (K, tq) transpose, transpose the small vh operand instead.
        av = lax.dot_general(p_t, vh, c_tn, preferred_element_type=jnp.float32)
        av_ref[:, sl] = av.astype(jnp.bfloat16)        # stage per-head AV in VMEM

    # One full-contraction o_net matmul, then residual + LayerNorm (f32 math).
    o = jnp.dot(av_ref[...], wot_ref[...], preferred_element_type=jnp.float32)
    pre = res_ref[0].astype(jnp.float32) + o           # dropout = identity (eval)
    mean = jnp.mean(pre, axis=-1, keepdims=True)
    var = jnp.mean(jnp.square(pre - mean), axis=-1, keepdims=True)
    norm = (pre - mean) * lax.rsqrt(var + 1e-5)
    out_ref[0] = (norm * gamma_ref[...] + beta_ref[...]).astype(out_ref.dtype)


def _fused_vmem_bytes(Q, tq, nhd, dm, R):
    bf2 = 2
    blocks = (Q * 3 * nhd * bf2         # resident qkv (per batch)
              + R * nhd * bf2           # resident r_k
              + nhd * dm * bf2          # resident o_net weight
              + 2 * tq * dm * bf2       # residual + output tiles
              + 2 * dm * 4)             # gamma / beta
    scratch = tq * nhd * bf2            # per-head AV staging
    temps = 10 * Q * (tq + 8) * 4       # live f32 (K, ~tq)-sized temporaries
    return 2 * blocks + scratch + temps  # x2 for double-buffered pipelining


def _fused_rel_attention(qkv, rk, resid, wo_t, gamma, beta, *, n_head, d_head,
                         q_tile):
    B, Q, three_nhd = qkv.shape
    nhd = three_nhd // 3
    R = rk.shape[0]
    dm = resid.shape[-1]
    assert Q % q_tile == 0
    n_qt = Q // q_tile
    est = _fused_vmem_bytes(Q, q_tile, nhd, dm, R)
    vmem_limit = int(min(max(2 * est, 32 * 1024 * 1024), 64 * 1024 * 1024))
    kernel = functools.partial(_fused_attn_kernel, n_head=n_head, d_head=d_head)
    return pl.pallas_call(
        kernel,
        out_shape=jax.ShapeDtypeStruct((B, Q, dm), jnp.bfloat16),
        grid=(B, n_qt),
        in_specs=[
            pl.BlockSpec((1, Q, three_nhd), lambda b, qi: (b, 0, 0)),  # resident q/k/v
            pl.BlockSpec((R, nhd), lambda b, qi: (0, 0)),              # resident r_k
            pl.BlockSpec((1, q_tile, dm), lambda b, qi: (b, qi, 0)),   # residual tile
            pl.BlockSpec((nhd, dm), lambda b, qi: (0, 0)),             # resident W_o^T
            pl.BlockSpec((1, dm), lambda b, qi: (0, 0)),
            pl.BlockSpec((1, dm), lambda b, qi: (0, 0)),
        ],
        out_specs=pl.BlockSpec((1, q_tile, dm), lambda b, qi: (b, qi, 0)),
        scratch_shapes=[pltpu.VMEM((q_tile, nhd), jnp.bfloat16)],
        compiler_params=pltpu.CompilerParams(
            dimension_semantics=("parallel", "parallel"),
            vmem_limit_bytes=vmem_limit),
    )(qkv, rk, resid, wo_t, gamma, beta)


def _pick_q_tile(q_len, target):
    if target >= q_len:
        return q_len
    t = min(target, q_len)
    t -= t % 8
    while t >= 8:
        if q_len % t == 0:
            return t
        t -= 8
    return q_len


# ----------------------------------- the module -----------------------------------

class RelMultiHeadAttn:
    def __init__(self, n_head, d_model, d_head, dropout, dropatt=0,
                 tgt_len=None, ext_len=None, mem_len=None, key=None, q_tile=256):
        self.n_head = n_head
        self.d_model = d_model
        self.d_head = d_head
        self.dropout = dropout          # identity in eval
        self.dropatt = dropatt          # identity in eval
        self.scale = 1.0 / (d_head ** 0.5)
        self.q_tile = q_tile

        key = jax.random.PRNGKey(0) if key is None else key
        k1, k2 = jax.random.split(key)
        nhd = n_head * d_head
        # nn.Linear weights are [out_features, in_features]; synthetic init at
        # roughly the PyTorch default scale (~1/sqrt(fan_in)).
        self.W_qkv = 0.1 * jax.random.normal(k1, (3 * nhd, d_model), jnp.float32)
        self.W_o = 0.1 * jax.random.normal(k2, (d_model, nhd), jnp.float32)
        self.ln_gamma = jnp.ones((1, d_model), jnp.float32)
        self.ln_beta = jnp.zeros((1, d_model), jnp.float32)

        # Weight prep hoisted out of __call__: fold the 1/sqrt(d_head) scale into
        # the q rows (q multiplies both AC and BD), transpose, bf16-cast once.
        # Folding before the bf16 cast only changes rounding vs. scaling f32
        # scores; well inside tolerance.
        w_qkv_scaled = self.W_qkv.at[:nhd].multiply(self.scale)
        self.wqkv_t = w_qkv_scaled.T.astype(jnp.bfloat16)    # (dm, 3*nhd)
        self.wo_t = self.W_o.T.astype(jnp.bfloat16)          # (nhd, dm)

    def __call__(self, w, r, attn_mask=None, mems=None):
        # TODO(synk): attn_mask / mems and the subclass-only r_w_bias / r_r_bias /
        # r_net are not part of the base-class path implemented here
        # (eval mode, unmasked, mems=None).
        assert attn_mask is None and mems is None
        qlen, bsz, d_model = w.shape
        rlen = r.shape[0]
        nh, dh = self.n_head, self.d_head
        nhd = nh * dh
        assert rlen == qlen, "mems=None path requires rlen == klen == qlen"
        assert qlen % 8 == 0  # TODO(synk): pad + mask for non-multiple-of-8 qlen

        tq = _pick_q_tile(qlen, self.q_tile)

        # One batch-major relayout of the d_model stream; all per-head / per-score
        # tensors stay inside the fused kernel (never round-trip HBM).
        w_bm = jnp.transpose(w, (1, 0, 2))                       # (B, Q, dm) f32
        res_bm = w_bm.astype(jnp.bfloat16)                       # bf16 residual
        x2d = w_bm.reshape(bsz * qlen, d_model)
        r2d = r.reshape(rlen, d_model)

        # Single projection launch: r's rows ride along with w's; only the K-slice
        # of their output is used (waste is O(rlen / (bsz*qlen))).
        xr = jnp.concatenate([x2d, r2d], axis=0).astype(jnp.bfloat16)
        proj = _tiled_matmul(xr, self.wqkv_t)                    # (B*Q+R, 3nhd) bf16
        qkv = proj[:bsz * qlen].reshape(bsz, qlen, 3 * nhd)
        rk = proj[bsz * qlen:, nhd:2 * nhd]                      # (R, nhd) bf16

        out_bm = _fused_rel_attention(
            qkv, rk, res_bm, self.wo_t, self.ln_gamma, self.ln_beta,
            n_head=nh, d_head=dh, q_tile=tq)                     # (B, Q, dm) bf16
        return jnp.transpose(out_bm, (1, 0, 2))                  # (Q, B, dm) bf16


# ------------------------------ pure-JAX reference ------------------------------

def _reference_forward(attn, w, r):
    qlen, bsz, dm = w.shape
    nh, dh = attn.n_head, attn.d_head
    nhd = nh * dh
    heads = w.reshape(qlen * bsz, dm) @ attn.W_qkv.T
    q = heads[:, :nhd].reshape(qlen, bsz, nh, dh)
    k = heads[:, nhd:2 * nhd].reshape(qlen, bsz, nh, dh)
    v = heads[:, 2 * nhd:].reshape(qlen, bsz, nh, dh)
    rk = (r.reshape(qlen, dm) @ attn.W_qkv[nhd:2 * nhd].T).reshape(qlen, nh, dh)
    ac = jnp.einsum("qbnd,kbnd->bnqk", q, k)
    bd = jnp.einsum("qbnd,rnd->bnqr", q, rk)
    B, H, Q, K = bd.shape
    pad = jnp.zeros((B, H, Q, 1), bd.dtype)
    bd = jnp.concatenate([pad, bd], axis=-1).reshape(B, H, K + 1, Q)[:, :, 1:, :]
    bd = bd.reshape(B, H, Q, K)
    p = jax.nn.softmax((ac + bd) * attn.scale, axis=-1)
    av = jnp.einsum("bnqk,kbnd->qbnd", p, v).reshape(qlen, bsz, nhd)
    pre = w + av @ attn.W_o.T
    mu = pre.mean(-1, keepdims=True)
    var = ((pre - mu) ** 2).mean(-1, keepdims=True)
    return ((pre - mu) * jax.lax.rsqrt(var + 1e-5) * attn.ln_gamma.reshape(1, 1, dm)
            + attn.ln_beta.reshape(1, 1, dm))


if __name__ == "__main__":
    n_head, d_model, d_head = 2, 32, 16
    qlen, bsz = 16, 2     # two q tiles of 8 -> exercises the rel-shift tile boundary

    attn = RelMultiHeadAttn(n_head, d_model, d_head, dropout=0.0, q_tile=8)

    kw, kr = jax.random.split(jax.random.PRNGKey(0))
    w = jax.random.normal(kw, (qlen, bsz, d_model), dtype=jnp.float32)
    r = jax.random.normal(kr, (qlen, 1, d_model), dtype=jnp.float32)

    out = jax.block_until_ready(attn(w, r))
    assert out.shape == (qlen, bsz, d_model)
    out32 = out.astype(jnp.float32)
    assert bool(jnp.all(jnp.isfinite(out32)))

    ref = jax.block_until_ready(_reference_forward(attn, w, r))
    err = float(jnp.max(jnp.abs(out32 - ref)))
    assert err < 5e-2, f"mismatch vs reference: max abs err = {err}"
    print("KERNEL_OK")
</pallas_src>

<mosaic_0001>
module attributes {stable_mosaic.version = 11 : i64} {
  func.func @_matmul_kernel(%arg0: i32, %arg1: i32, %arg2: i32, %arg3: memref<48x128xbf16, #tpu.memory_space<vmem>>, %arg4: memref<128x128xbf16, #tpu.memory_space<vmem>>, %arg5: memref<48x128xbf16, #tpu.memory_space<vmem>>, %arg6: memref<48x128xf32, #tpu.memory_space<vmem>>) attributes {dimension_semantics = [#tpu.dimension_semantics<parallel>, #tpu.dimension_semantics<parallel>, #tpu.dimension_semantics<arbitrary>], iteration_bounds = array<i64: 1, 1, 1>, scalar_prefetch = 0 : i64, scratch_operands = 1 : i64, tpu.core_type = #tpu.core_type<tc>, window_params = [{transform_indices = @transform_0, window_bounds = array<i64: 48, 128>}, {transform_indices = @transform_1, window_bounds = array<i64: 128, 128>}, {transform_indices = @transform_2, window_bounds = array<i64: 48, 128>}]} {
    %c0_i32 = arith.constant 0 : i32
    %0 = arith.cmpi eq, %arg2, %c0_i32 : i32
    %1 = arith.extui %0 : i1 to i32
    %c0_i32_0 = arith.constant 0 : i32
    %2 = arith.cmpi ne, %1, %c0_i32_0 : i32
    scf.if %2 {
      %cst_10 = arith.constant 0.000000e+00 : f32
      %12 = vector.broadcast %cst_10 : f32 to vector<48x128xf32>
      %c0_11 = arith.constant 0 : index
      %c0_12 = arith.constant 0 : index
      %13 = vector.load %arg6[%c0_11, %c0_12] : memref<48x128xf32, #tpu.memory_space<vmem>>, vector<48x128xf32>
      tpu.vector_store %arg6[%c0_11, %c0_12], %12 {strides = array<i32>} : memref<48x128xf32, #tpu.memory_space<vmem>>, vector<48x128xf32>,
    } else {
    }
    %c0 = arith.constant 0 : index
    %c0_1 = arith.constant 0 : index
    %3 = vector.load %arg6[%c0, %c0_1] : memref<48x128xf32, #tpu.memory_space<vmem>>, vector<48x128xf32>
    %c0_2 = arith.constant 0 : index
    %c0_3 = arith.constant 0 : index
    %4 = vector.load %arg3[%c0_2, %c0_3] : memref<48x128xbf16, #tpu.memory_space<vmem>>, vector<48x128xbf16>
    %c0_4 = arith.constant 0 : index
    %c0_5 = arith.constant 0 : index
    %5 = vector.load %arg4[%c0_4, %c0_5] : memref<128x128xbf16, #tpu.memory_space<vmem>>, vector<128x128xbf16>
    %cst = arith.constant dense<0.000000e+00> : vector<48x128xf32>
    %6 = tpu.matmul %4, %5, %cst {dimension_numbers = #tpu.dot_dimension_numbers<[1], [0], [0], [1], [0, 0, 1, 1], [], []>} : vector<48x128xbf16>, vector<128x128xbf16>, vector<48x128xf32> -> vector<48x128xf32>
    %7 = arith.addf %3, %6 : vector<48x128xf32>
    %c0_6 = arith.constant 0 : index
    %c0_7 = arith.constant 0 : index
    %8 = vector.load %arg6[%c0_6, %c0_7] : memref<48x128xf32, #tpu.memory_space<vmem>>, vector<48x128xf32>
    tpu.vector_store %arg6[%c0_6, %c0_7], %7 {strides = array<i32>} : memref<48x128xf32, #tpu.memory_space<vmem>>, vector<48x128xf32>,
    %c0_i32_8 = arith.constant 0 : i32
    %9 = arith.cmpi eq, %arg2, %c0_i32_8 : i32
    %10 = arith.extui %9 : i1 to i32
    %c0_i32_9 = arith.constant 0 : i32
    %11 = arith.cmpi ne, %10, %c0_i32_9 : i32
    scf.if %11 {
      %c0_10 = arith.constant 0 : index
      %c0_11 = arith.constant 0 : index
      %12 = vector.load %arg6[%c0_10, %c0_11] : memref<48x128xf32, #tpu.memory_space<vmem>>, vector<48x128xf32>
      %13 = arith.truncf %12 : vector<48x128xf32> to vector<48x128xbf16>
      %c0_12 = arith.constant 0 : index
      %c0_13 = arith.constant 0 : index
      %14 = vector.load %arg5[%c0_12, %c0_13] : memref<48x128xbf16, #tpu.memory_space<vmem>>, vector<48x128xbf16>
      tpu.vector_store %arg5[%c0_12, %c0_13], %13 {strides = array<i32>} : memref<48x128xbf16, #tpu.memory_space<vmem>>, vector<48x128xbf16>,
    } else {
    }
    return
  }
  func.func @transform_0(%arg0: i32, %arg1: i32, %arg2: i32) -> (i32, i32) {
    %c0_i32 = arith.constant 0 : i32
    return %arg0, %arg2 : i32, i32
  }
  func.func @transform_1(%arg0: i32, %arg1: i32, %arg2: i32) -> (i32, i32) {
    %c0_i32 = arith.constant 0 : i32
    return %arg2, %arg1 : i32, i32
  }
  func.func @transform_2(%arg0: i32, %arg1: i32, %arg2: i32) -> (i32, i32) {
    %c0_i32 = arith.constant 0 : i32
    return %arg0, %arg1 : i32, i32
  }
}

</mosaic_0001>

<bundles_post_ra>
// kernel: tpu_custom_call.1
= control target key start
LH: loop header
LB: loop body
LE: loop exit
PB: predicated region body
PF: predicated region fallthrough
CT: control target
= control target key end

     0   :  { %7 = vsyncpa [#allocation4], 0  ;;  %s493_s0 = inlined_call_operand.hbm [shape: bf16[48,128], index: 0, kind: input, shape index: {}]   ;;  %s494_s1 = inlined_call_operand.hbm [shape: bf16[128,128], index: 1, kind: input, shape index: {}]   ;;  %s495_s2 = inlined_call_operand.hbm [shape: bf16[48,128], index: 2, kind: output, shape index: {}]  }
   0x1   :  { %8 = vsyncpa [#allocation7], 0 }
   0x2   :  { %9 = vsyncpa [#allocation5], 0  ;;  %s450_s9 = smov [#allocation3]  }
   0x3   :  { %s15_s10 = sshll.u32 %s450_s9, 4  ;;  %s16_s10 = int_to_ptr.vmem [resolvable:$true] %s15_s10 }
   0x4   :  { %s392_s11 = scalar_lea.vmem %s16_s10, 384  ;;  %p397_p1 = scmp.lt.s32.totalorder %s16_s10, %s16_s10 }
   0x5   :  { %p393_p0 = scmp.ne.s32.totalorder %s16_s10, %s392_s11  ;;  %p398_p2 = scmp.lt.s32.totalorder %s392_s11, %s392_s11 }
   0x7   :  { %p399_p3 = por %p398_p2, %p397_p1 }
   0x9   :  { %p400_p4 = pnand %p399_p3, %p393_p0 }
   0xb   :  { %403 = shalt.err (!%p400_p4)
}
   0xc   :  { %s451_s12 = smov 64   ;;  %s452_s13 = smov 4  }
   0xd   :  { %21 = dma.hbm_to_vmem [thread:$0]  %s493_s0, 384, %s16_s10, [#allocation4], %s451_s12, %s451_s12, %s452_s13  }
   0xe   :  { %s453_s16 = smov [#allocation6]  }
   0xf   :  { %s27_s17 = sshll.u32 %s453_s16, 4  ;;  %s28_s17 = int_to_ptr.vmem [resolvable:$true] %s27_s17 }
  0x10   :  { %s412_s18 = scalar_lea.vmem %s28_s17, 1024  ;;  %p417_p6 = scmp.lt.s32.totalorder %s28_s17, %s28_s17 }
  0x11   :  { %p413_p5 = scmp.ne.s32.totalorder %s28_s17, %s412_s18  ;;  %p418_p7 = scmp.lt.s32.totalorder %s412_s18, %s412_s18 }
  0x13   :  { %p419_p8 = por %p418_p7, %p417_p6 }
  0x15   :  { %p420_p9 = pnand %p419_p8, %p413_p5 }
  0x17   :  { %423 = shalt.err (!%p420_p9)
}
  0x18   :  { %33 = dma.hbm_to_vmem [thread:$0]  %s494_s1, 1024, %s28_s17, [#allocation7], %s451_s12, %s451_s12, %s452_s13  }
  0x19   :  { %444 = dma.done.wait [#allocation4], 384  }
  0x1a   :  { %445 = vsyncadd [#allocation4], 4294966912 }
  0x1b   :  { %446 = dma.done.wait [#allocation7], 1024  }
  0x1c   :  { %447 = vsyncadd [#allocation7], 4294966272  ;;  %v454_v0 = vmov 0.0   ;;  %vm455_vm0 = vmmov 0   ;;  %v373_v1 = vld [vmem:[#allocation6 + $0x38] sm:$0xff]   ;;  %v374_v2 = vld [vmem:[#allocation6 + $0x30] sm:$0xff]  }
  0x1d   :  { %350 = vmatprep.subr.bf16.mxu1 %v454_v0  ;;  %322 = vmatprep.subr.bf16.mxu0 %v454_v0  ;;  %v375_v3 = vld [vmem:[#allocation6 + $0x28] sm:$0xff]   ;;  %v376_v4 = vld [vmem:[#allocation6 + $0x20] sm:$0xff]   ;;  %v377_v5 = vld [vmem:[#allocation6 + $0x18] sm:$0xff]   ;;  %s456_s0 = smov [#allocation8]  }
  0x1e   :  { %342 = vmatprep.mubr.msk.bf16.mxu1 %vm455_vm0, %v454_v0  ;;  %338 = vmatprep.mubr.msk.bf16.mxu0 %vm455_vm0, %v454_v0  ;;  %v378_v6 = vld [vmem:[#allocation6 + $0x10] sm:$0xff]   ;;  %v379_v7 = vld [vmem:[#allocation6 + $0x8] sm:$0xff]   ;;  %v380_v8 = vld [vmem:[#allocation6] sm:$0xff]   ;;  %s258_s1 = sshll.u32 %s456_s0, 4  ;;  %s259_s1 = int_to_ptr.vmem [resolvable:$true] %s258_s1 }
  0x1f   :  { %358 = vmatpush3.bf16.msra.mxu1 %v373_v1  ;;  %323 = vmatpush3.bf16.msra.mxu0 %v373_v1  ;;  %v381_v9 = vld [vmem:[#allocation3 + $0x8] sm:$0xff]   ;;  %v382_v10 = vld [vmem:[#allocation3] sm:$0xff]   ;;  %v383_v11 = vld [vmem:[#allocation3 + $0x10] sm:$0xff]   ;;  %s424_s21 = scalar_lea.vmem %s259_s1, 384  ;;  %p429_p11 = scmp.lt.s32.totalorder %s259_s1, %s259_s1 }
  0x20   :  { %351 = vmatprep.subr.bf16.mxu1 %v454_v0  ;;  %324 = vmatprep.subr.bf16.mxu0 %v454_v0  ;;  %p425_p10 = scmp.ne.s32.totalorder %s259_s1, %s424_s21  ;;  %p430_p12 = scmp.lt.s32.totalorder %s424_s21, %s424_s21 }
  0x22   :  { %p431_p13 = por %p430_p12, %p429_p11 }
  0x23   :  { %359 = vmatpush3.bf16.msra.mxu1 %v374_v2  ;;  %325 = vmatpush3.bf16.msra.mxu0 %v374_v2 }
  0x24   :  { %352 = vmatprep.subr.bf16.mxu1 %v454_v0  ;;  %326 = vmatprep.subr.bf16.mxu0 %v454_v0  ;;  %p432_p0 = pnand %p431_p13, %p425_p10 }
  0x27   :  { %360 = vmatpush3.bf16.msra.mxu1 %v375_v3  ;;  %327 = vmatpush3.bf16.msra.mxu0 %v375_v3 }
  0x28   :  { %353 = vmatprep.subr.bf16.mxu1 %v454_v0  ;;  %328 = vmatprep.subr.bf16.mxu0 %v454_v0 }
  0x2b   :  { %361 = vmatpush3.bf16.msra.mxu1 %v376_v4  ;;  %329 = vmatpush3.bf16.msra.mxu0 %v376_v4 }
  0x2c   :  { %354 = vmatprep.subr.bf16.mxu1 %v454_v0  ;;  %330 = vmatprep.subr.bf16.mxu0 %v454_v0 }
  0x2f   :  { %362 = vmatpush3.bf16.msra.mxu1 %v377_v5  ;;  %331 = vmatpush3.bf16.msra.mxu0 %v377_v5 }
  0x30   :  { %355 = vmatprep.subr.bf16.mxu1 %v454_v0  ;;  %332 = vmatprep.subr.bf16.mxu0 %v454_v0 }
  0x33   :  { %363 = vmatpush3.bf16.msra.mxu1 %v378_v6  ;;  %333 = vmatpush3.bf16.msra.mxu0 %v378_v6 }
  0x34   :  { %356 = vmatprep.subr.bf16.mxu1 %v454_v0  ;;  %334 = vmatprep.subr.bf16.mxu0 %v454_v0 }
  0x37   :  { %364 = vmatpush3.bf16.msra.mxu1 %v379_v7  ;;  %335 = vmatpush3.bf16.msra.mxu0 %v379_v7 }
  0x38   :  { %357 = vmatprep.subr.bf16.mxu1 %v454_v0  ;;  %336 = vmatprep.subr.bf16.mxu0 %v454_v0 }
  0x3b   :  { %365 = vmatpush3.bf16.msra.mxu1 %v380_v8  ;;  %337 = vmatpush3.bf16.msra.mxu0 %v380_v8 }
  0x3e   :  { %343 = vmatmul.mubr.bf16.vlgmr.msra.gmra.mxu1 %v381_v9  ;;  %339 = vmatmul.mubr.bf16.vlgmr.msra.gmra.mxu0 %v382_v10 }
  0x3f   :  { %346 = vmatprep.mubr.msk.bf16.mxu1 %vm455_vm0, %v454_v0 }
  0x46   :  { %347 = vmatmul.mubr.bf16.gmra.mxu1 %v383_v11 }
  0xfe   :  { %v187_v12 = vpop.f32.mrf.mxu1  ;;  %v179_v13 = vpop.f32.mrf.mxu0 }
 0x100   :  { %v344_v14 = vpop.f32.mrf.mxu1  ;;  %v340_v15 = vpop.f32.mrf.mxu0 }
 0x102   :  { %v190_v16 = vpop.f32.mrf.mxu1  ;;  %v182_v17 = vpop.f32.mrf.mxu0 }
 0x103   :  { %v302_v18 = vpack.c.bf16 %v190_v16, %v187_v12  ;;  %v297_v19 = vpack.c.bf16 %v182_v17, %v179_v13 }
 0x104   :  { %v345_v20 = vpop.f32.mrf.mxu1  ;;  %v341_v21 = vpop.f32.mrf.mxu0 }
 0x105   :  { %309 = vst [vmem:[#allocation8 + $0x8] sm:$0xff] %v302_v18   ;;  %298 = vst [vmem:[#allocation8] sm:$0xff] %v297_v19  }
 0x106   :  { %v195_v22 = vpop.f32.mrf.mxu1 }
 0x108   :  { %v348_v23 = vpop.f32.mrf.mxu1 }
 0x10a   :  { %v198_v24 = vpop.f32.mrf.mxu1 }
 0x10b   :  { %v307_v25 = vpack.c.bf16 %v198_v24, %v195_v22 }
 0x10c   :  { %v349_v26 = vpop.f32.mrf.mxu1 }
 0x10d   :  { %310 = vst [vmem:[#allocation8 + $0x10] sm:$0xff] %v307_v25  }
 0x10e   :  { %435 = shalt.err (!%p432_p0)
}
 0x10f   :  { %264 = dma.vmem_to_hbm [thread:$0]  %s259_s1, 384, %s495_s2, [#allocation5], %s451_s12, %s451_s12, %s452_s13  }
 0x110   :  { %448 = dma.done.wait [#allocation5], 384  }
 0x111   :  { %449 = vsyncadd [#allocation5], 4294966912 }
 0x112   :  { %268 = vsyncpa [#allocation4], 1 }
 0x113   :  { %269 = vsyncpa [#allocation7], 1 }
 0x114   :  { %270 = vsyncpa [#allocation5], 1 }

</bundles_post_ra>
